<compile_context>
chip_gen: v5e
topology: v5e:2x2
jax: 0.10.0
libtpu: 0.0.40
codegen_flags: <defaults>
</compile_context>

<pallas_src>
import functools

import jax
import jax.numpy as jnp
from jax.experimental import pallas as pl
from jax.experimental.pallas import tpu as pltpu


def _round_up(x: int, m: int) -> int:
    return ((x + m - 1) // m) * m


def _vmem_capacity_bytes() -> int:
    """Per-core VMEM capacity; conservative fallback is v7x (64 MiB/TC)."""
    try:
        cap = int(pltpu.get_tpu_info().vmem_capacity_bytes)
        if cap > 0:
            return cap
    except Exception:
        pass
    return 64 * 1024 * 1024


def mtl_ce_lr_kernel(w_ref, x_ref, o_ref, acc_ref, *, d_total, Dk, mask_d):
    """One grid step: partial contraction over a d block for a (Tb, Nb) tile.

    w_ref:   (Tb, Dk)      weight slice for this task tile / d block
    x_ref:   (Tb, Nb, Dk)  examples for this (task, instance, d) block
    o_ref:   (Tb, Nb)      predictions (written on the last d block)
    acc_ref: (Tb, Nb) f32  accumulator scratch (resident across the d axis)
    """
    kd = pl.program_id(2)

    @pl.when(kd == 0)
    def _():
        acc_ref[...] = jnp.zeros_like(acc_ref)

    w = w_ref[...].astype(jnp.float32)                 # (Tb, Dk)
    x = x_ref[...].astype(jnp.float32)                 # (Tb, Nb, Dk)
    # Contract over d with a sublane-broadcast multiply + lane reduction.
    # No transpose of X, no degenerate 1-row MXU matvec; kernel is HBM-bound.
    prod = x * w[:, None, :]                           # (Tb, Nb, Dk)
    if mask_d:
        # d is not a multiple of Dk: zero the out-of-range tail of the
        # reduction axis so boundary-block garbage cannot leak into valid
        # outputs (OOB reads are "don't care" and may contain NaN).
        idx = jax.lax.broadcasted_iota(jnp.int32, prod.shape, dimension=2)
        prod = jnp.where(idx + kd * Dk < d_total, prod, 0.0)
    acc_ref[...] += jnp.sum(prod, axis=-1)

    @pl.when(kd == pl.num_programs(2) - 1)
    def _():
        o_ref[...] = acc_ref[...].astype(o_ref.dtype)


@functools.partial(
    jax.jit,
    static_argnames=("Tb", "Nb", "Dk", "mask_d", "vmem_limit_bytes",
                     "compute_dtype"),
)
def _mtl_ce_lr_predict_impl(M, N, X, *, Tb, Nb, Dk, mask_d, vmem_limit_bytes,
                            compute_dtype):
    T, N_m, d = X.shape

    # Hoist the tiny weight matmul out of the kernel:  W = (M @ N.T).T = N @ M.T
    W = jnp.dot(N, M.T)                                            # (T, d) f32

    # Optional narrow-precision streaming of the HBM-bound operands
    # (f32 accumulation inside the kernel).
    W = W.astype(compute_dtype)
    X = X.astype(compute_dtype)

    # Grid: (N tiles, T tiles, d tiles).  Large N axis outermost & parallel so
    # v7x megacore shards it; d axis innermost and "arbitrary" (reduction).
    grid = (pl.cdiv(N_m, Nb), pl.cdiv(T, Tb), pl.cdiv(d, Dk))

    kernel = functools.partial(mtl_ce_lr_kernel, d_total=d, Dk=Dk, mask_d=mask_d)

    return pl.pallas_call(
        kernel,
        out_shape=jax.ShapeDtypeStruct((T, N_m), jnp.float32),
        grid_spec=pltpu.PrefetchScalarGridSpec(
            num_scalar_prefetch=0,
            grid=grid,
            in_specs=[
                pl.BlockSpec((Tb, Dk), lambda j, i, kd: (i, kd)),         # W
                pl.BlockSpec((Tb, Nb, Dk), lambda j, i, kd: (i, j, kd)),  # X
            ],
            out_specs=pl.BlockSpec((Tb, Nb), lambda j, i, kd: (i, j)),
            scratch_shapes=[pltpu.VMEM((Tb, Nb), jnp.float32)],
        ),
        compiler_params=pltpu.CompilerParams(
            dimension_semantics=("parallel", "parallel", "arbitrary"),
            vmem_limit_bytes=vmem_limit_bytes,
        ),
    )(W, X)


def mtl_ce_lr_predict(M, N, X, *, compute_dtype=jnp.float32,
                      x_pair_budget_bytes=None):
    """pred[t] = ((M @ N.T).T)[t] @ X[t].T for all tasks, stacked.

    M: (d, k), N: (T, k), X: (T, N_m, d).  Returns (T, N_m) float32.
    compute_dtype=jnp.bfloat16 halves HBM traffic of this bandwidth-bound
    kernel (most worthwhile when X is already produced in bf16 upstream);
    the default float32 path matches the PyTorch module's numerics.
    """
    M = jnp.asarray(M, jnp.float32)
    N = jnp.asarray(N, jnp.float32)
    X = jnp.asarray(X, jnp.float32)
    T, N_m, d = X.shape

    compute_dtype = jnp.dtype(compute_dtype)
    itemsize = compute_dtype.itemsize

    # ---- generation-aware VMEM budget ------------------------------------
    vmem_cap = _vmem_capacity_bytes()          # 64 MiB (v7x) / 128 MiB (v5e/v6e)
    if x_pair_budget_bytes is None:
        x_pair_budget_bytes = vmem_cap // 2    # double-buffered X pair
    vmem_limit_bytes = (vmem_cap * 3) // 4     # headroom for out buffers/scratch

    # ---- tile selection ---------------------------------------------------
    Tb = T if T < 8 else 8                     # full sublane rows when possible
    d_pad = _round_up(d, 128)                  # d sits on the lane axis in VMEM
    # Lane-dense instance tile, never exceeding the array extent (no padding).
    nb_cap = N_m if N_m <= 128 else (N_m // 128) * 128
    min_nb = min(nb_cap, 128)

    max_nb_full = x_pair_budget_bytes // (2 * Tb * d_pad * itemsize)
    if max_nb_full >= min_nb:
        # The full d extent fits in one block: no reduction-axis tiling.
        Dk, mask_d = d, False
        Nb = nb_cap if N_m <= 128 else min(nb_cap, (max_nb_full // 128) * 128)
    else:
        # d too large for one slab: tile the reduction axis, accumulate in f32.
        Nb = min(nb_cap, 512)
        max_dk = x_pair_budget_bytes // (2 * Tb * Nb * itemsize)
        Dk = max(128, (max_dk // 128) * 128)
        if Dk >= d:
            Dk, mask_d = d, False
        else:
            mask_d = (d % Dk) != 0

    return _mtl_ce_lr_predict_impl(
        M, N, X, Tb=Tb, Nb=Nb, Dk=Dk, mask_d=mask_d,
        vmem_limit_bytes=vmem_limit_bytes, compute_dtype=compute_dtype)


def mtl_ce_lr_forward(M, N, X_list, **kwargs):
    """Drop-in equivalent of MTL_CE_LR.forward: list of (N_m, d) in,
    list of (N_m,) predictions out."""
    # TODO(synk): the PyTorch module allows ragged per-task N_m; supporting that
    # would need per-task padding+masking or a scalar-prefetch/BoundedSlice design.
    X = jnp.stack([jnp.asarray(x, jnp.float32) for x in X_list], axis=0)
    preds = mtl_ce_lr_predict(M, N, X, **kwargs)                   # (T, N_m)
    return [preds[i] for i in range(preds.shape[0])]


if __name__ == "__main__":
    def ref_preds(M, N, X):
        W_ref = (M @ N.T).T                                        # (T, d)
        return jnp.einsum("td,tnd->tn", W_ref, X)                  # (T, N_m)

    # --- case 1: small shapes consistent with the module --------------------
    T, d, k, N_m = 4, 32, 8, 16
    kM, kN, kX = jax.random.split(jax.random.PRNGKey(0), 3)
    M = jax.random.normal(kM, (d, k), dtype=jnp.float32)
    N = jax.random.normal(kN, (T, k), dtype=jnp.float32)
    X = jax.random.normal(kX, (T, N_m, d), dtype=jnp.float32)      # pre-stacked

    preds = jax.block_until_ready(mtl_ce_lr_predict(M, N, X))      # (T, N_m)
    ref = ref_preds(M, N, X)
    assert preds.shape == (T, N_m)
    assert jnp.allclose(preds, ref, atol=1e-4, rtol=1e-4), "f32 mismatch"

    # bf16 streaming path (halved HBM traffic); compare against bf16-rounded ref.
    preds_bf16 = jax.block_until_ready(
        mtl_ce_lr_predict(M, N, X, compute_dtype=jnp.bfloat16))
    W_b = ((M @ N.T).T).astype(jnp.bfloat16).astype(jnp.float32)
    X_b = X.astype(jnp.bfloat16).astype(jnp.float32)
    ref_b = jnp.einsum("td,tnd->tn", W_b, X_b)
    assert jnp.allclose(preds_bf16, ref_b, atol=1e-2, rtol=1e-2), "bf16 mismatch"

    # list-based drop-in API
    preds_list = mtl_ce_lr_forward(M, N, [X[i] for i in range(T)])
    for i in range(T):
        assert preds_list[i].shape == (N_m,)
        assert jnp.allclose(preds_list[i], ref[i], atol=1e-4, rtol=1e-4)

    # --- case 2: unaligned T / N_m exercising boundary-block masking --------
    T2, d2, k2, N_m2 = 5, 40, 8, 200
    kM, kN, kX = jax.random.split(jax.random.PRNGKey(1), 3)
    M2 = jax.random.normal(kM, (d2, k2), dtype=jnp.float32)
    N2 = jax.random.normal(kN, (T2, k2), dtype=jnp.float32)
    X2 = jax.random.normal(kX, (T2, N_m2, d2), dtype=jnp.float32)
    preds2 = jax.block_until_ready(mtl_ce_lr_predict(M2, N2, X2))
    assert jnp.allclose(preds2, ref_preds(M2, N2, X2), atol=1e-3, rtol=1e-3)

    # --- case 3: force the d-tiled reduction path (tiny VMEM budget) --------
    T3, d3, k3, N_m3 = 3, 300, 8, 160
    kM, kN, kX = jax.random.split(jax.random.PRNGKey(2), 3)
    M3 = jax.random.normal(kM, (d3, k3), dtype=jnp.float32)
    N3 = jax.random.normal(kN, (T3, k3), dtype=jnp.float32)
    X3 = jax.random.normal(kX, (T3, N_m3, d3), dtype=jnp.float32)
    preds3 = jax.block_until_ready(
        mtl_ce_lr_predict(M3, N3, X3, x_pair_budget_bytes=1 << 20))
    assert jnp.allclose(preds3, ref_preds(M3, N3, X3), atol=1e-3, rtol=1e-3)

    print("KERNEL_OK")
</pallas_src>

<mosaic_0001>
module attributes {stable_mosaic.version = 11 : i64} {
  func.func @mtl_ce_lr_kernel(%arg0: i32, %arg1: i32, %arg2: i32, %arg3: memref<4x32xf32, #tpu.memory_space<vmem>>, %arg4: memref<4x16x32xf32, #tpu.memory_space<vmem>>, %arg5: memref<4x16xf32, #tpu.memory_space<vmem>>, %arg6: memref<4x16xf32, #tpu.memory_space<vmem>>) attributes {dimension_semantics = [#tpu.dimension_semantics<parallel>, #tpu.dimension_semantics<parallel>, #tpu.dimension_semantics<arbitrary>], iteration_bounds = array<i64: 1, 1, 1>, scalar_prefetch = 0 : i64, scratch_operands = 1 : i64, tpu.core_type = #tpu.core_type<tc>, window_params = [{transform_indices = @transform_0, window_bounds = array<i64: 4, 32>}, {transform_indices = @transform_1, window_bounds = array<i64: 4, 16, 32>}, {transform_indices = @transform_2, window_bounds = array<i64: 4, 16>}]} {
    %c0_i32 = arith.constant 0 : i32
    %0 = arith.cmpi eq, %arg2, %c0_i32 : i32
    %1 = arith.extui %0 : i1 to i32
    %c0_i32_0 = arith.constant 0 : i32
    %2 = arith.cmpi ne, %1, %c0_i32_0 : i32
    scf.if %2 {
      %cst_11 = arith.constant 0.000000e+00 : f32
      %15 = vector.broadcast %cst_11 : f32 to vector<4x16xf32>
      %c0_12 = arith.constant 0 : index
      %c0_13 = arith.constant 0 : index
      %16 = vector.load %arg6[%c0_12, %c0_13] : memref<4x16xf32, #tpu.memory_space<vmem>>, vector<4x16xf32>
      tpu.vector_store %arg6[%c0_12, %c0_13], %15 {strides = array<i32>} : memref<4x16xf32, #tpu.memory_space<vmem>>, vector<4x16xf32>,
    } else {
    }
    %c0 = arith.constant 0 : index
    %c0_1 = arith.constant 0 : index
    %3 = vector.load %arg3[%c0, %c0_1] : memref<4x32xf32, #tpu.memory_space<vmem>>, vector<4x32xf32>
    %c0_2 = arith.constant 0 : index
    %c0_3 = arith.constant 0 : index
    %c0_4 = arith.constant 0 : index
    %4 = vector.load %arg4[%c0_2, %c0_3, %c0_4] : memref<4x16x32xf32, #tpu.memory_space<vmem>>, vector<4x16x32xf32>
    %5 = vector.shape_cast %3 : vector<4x32xf32> to vector<4x1x32xf32>
    %6 = vector.broadcast %5 : vector<4x1x32xf32> to vector<4x16x32xf32>
    %7 = arith.mulf %4, %6 : vector<4x16x32xf32>
    %c0_5 = arith.constant 0 : index
    %c0_6 = arith.constant 0 : index
    %8 = vector.load %arg6[%c0_5, %c0_6] : memref<4x16xf32, #tpu.memory_space<vmem>>, vector<4x16xf32>
    %cst = arith.constant dense<0.000000e+00> : vector<4x16xf32>
    %9 = vector.multi_reduction <add>, %7, %cst [2] : vector<4x16x32xf32> to vector<4x16xf32>
    %10 = arith.addf %8, %9 : vector<4x16xf32>
    %c0_7 = arith.constant 0 : index
    %c0_8 = arith.constant 0 : index
    %11 = vector.load %arg6[%c0_7, %c0_8] : memref<4x16xf32, #tpu.memory_space<vmem>>, vector<4x16xf32>
    tpu.vector_store %arg6[%c0_7, %c0_8], %10 {strides = array<i32>} : memref<4x16xf32, #tpu.memory_space<vmem>>, vector<4x16xf32>,
    %c0_i32_9 = arith.constant 0 : i32
    %12 = arith.cmpi eq, %arg2, %c0_i32_9 : i32
    %13 = arith.extui %12 : i1 to i32
    %c0_i32_10 = arith.constant 0 : i32
    %14 = arith.cmpi ne, %13, %c0_i32_10 : i32
    scf.if %14 {
      %c0_11 = arith.constant 0 : index
      %c0_12 = arith.constant 0 : index
      %15 = vector.load %arg6[%c0_11, %c0_12] : memref<4x16xf32, #tpu.memory_space<vmem>>, vector<4x16xf32>
      %c0_13 = arith.constant 0 : index
      %c0_14 = arith.constant 0 : index
      %16 = vector.load %arg5[%c0_13, %c0_14] : memref<4x16xf32, #tpu.memory_space<vmem>>, vector<4x16xf32>
      tpu.vector_store %arg5[%c0_13, %c0_14], %15 {strides = array<i32>} : memref<4x16xf32, #tpu.memory_space<vmem>>, vector<4x16xf32>,
    } else {
    }
    return
  }
  func.func @transform_0(%arg0: i32, %arg1: i32, %arg2: i32) -> (i32, i32) {
    %c0_i32 = arith.constant 0 : i32
    return %arg1, %arg2 : i32, i32
  }
  func.func @transform_1(%arg0: i32, %arg1: i32, %arg2: i32) -> (i32, i32, i32) {
    %c0_i32 = arith.constant 0 : i32
    return %arg1, %arg0, %arg2 : i32, i32, i32
  }
  func.func @transform_2(%arg0: i32, %arg1: i32, %arg2: i32) -> (i32, i32) {
    %c0_i32 = arith.constant 0 : i32
    return %arg1, %arg0 : i32, i32
  }
}

</mosaic_0001>

<bundles_post_ra>
// kernel: _mtl_ce_lr_predict_impl.1
= control target key start
LH: loop header
LB: loop body
LE: loop exit
PB: predicated region body
PF: predicated region fallthrough
CT: control target
= control target key end

     0   :  { %7 = vsyncpa [#allocation4], 0  ;;  %s246_s0 = inlined_call_operand.vmem [shape: f32[4,32], index: 0, kind: input, shape index: {}]   ;;  %s247_s1 = inlined_call_operand.hbm [shape: f32[4,16,32], index: 1, kind: input, shape index: {}]   ;;  %s248_s2 = inlined_call_operand.hbm [shape: f32[4,16], index: 2, kind: output, shape index: {}]  }
   0x1   :  { %8 = vsyncpa [#allocation5], 0  ;;  %s15_s11 = sshll.u32 %s247_s1, 4  ;;  %s202_s12 = smov [#allocation3]   ;;  %s16_s11 = int_to_ptr.hbm [resolvable:$true] %s15_s11 }
   0x2   :  { %s17_s13 = sshll.u32 %s202_s12, 4  ;;  %s203_s14 = smov 128   ;;  %s18_s13 = int_to_ptr.vmem [resolvable:$true] %s17_s13 }
   0x3   :  { %s204_s15 = smov 8  }
   0x4   :  { %23 = dma.hbm_to_vmem [thread:$0]  %s16_s11, 1024, %s18_s13, [#allocation4], %s203_s14, %s203_s14, %s204_s15  }
   0x5   :  { %198 = dma.done.wait [#allocation4], 1024  }
   0x6   :  { %199 = vsyncadd [#allocation4], 4294966272  ;;  %v34_v0 = vld [vmem:[%s246_s0] sm:$0xf]  ;;  %v35_v1 = vld [vmem:[#allocation3] sm:$0xff]  ;;  %vm64_vm0 = vcmask 261120   ;;  %v97_v36 = vlaneseq }
   0x7   :  { %v47_v2 = vperm.slane %v34_v0, 0  ;;  %v45_v3 = vrot.slane %v34_v0, 2  ;;  %v44_v4 = vrot.slane %v34_v0, 1  ;;  %v39_v5 = vld [vmem:[#allocation3 + $0x20] sm:$0xff]  ;;  %v37_v6 = vld [vmem:[#allocation3 + $0x10] sm:$0xff]  ;;  %v36_v10 = vld [vmem:[#allocation3 + $0x8] sm:$0xff] }
   0x8   :  { %v40_v14 = vld [vmem:[#allocation3 + $0x28] sm:$0xff]  ;;  %v38_v15 = vld [vmem:[#allocation3 + $0x18] sm:$0xff]  ;;  %v46_v19 = vrot.slane %v34_v0, 3  ;;  %v41_v24 = vld [vmem:[#allocation3 + $0x30] sm:$0xff]  ;;  %vm32_vm1 = vcmask 125952   ;;  %v205_v32 = vmov 0.0  }
   0x9   :  { %v55_v7 = vmul.f32 %v47_v2, %v35_v1  ;;  %v49_v8 = vperm.slane %v45_v3, 0  ;;  %v48_v9 = vperm.slane %v44_v4, 0  ;;  %v56_v18 = vmul.f32 %v47_v2, %v36_v10  ;;  %v42_v27 = vld [vmem:[#allocation3 + $0x38] sm:$0xff]  ;;  %33 = vst.msk [vmem:[#allocation2] sm:$0xf] %vm32_vm1, %v205_v32  ;;  %s206_s0 = smov [#allocation6]  }
   0xa   :  { %v50_v23 = vperm.slane %v46_v19, 0  ;;  %v98_v37 = vand.u32 127, %v97_v36  ;;  %vm102_vm2 = vcmask 130112   ;;  %vm113_vm3 = vcmask 1041409   ;;  %s133_s1 = sshll.u32 %s206_s0, 4  ;;  %s135_s20 = sshll.u32 %s248_s2, 4  ;;  %s134_s1 = int_to_ptr.vmem [resolvable:$true] %s133_s1  ;;  %s136_s20 = int_to_ptr.hbm [resolvable:$true] %s135_s20 }
   0xb   :  { %v65_v11 = vsel %vm64_vm0, %v55_v7, 0.0  ;;  %v59_v12 = vmul.f32 %v49_v8, %v39_v5  ;;  %v57_v13 = vmul.f32 %v48_v9, %v37_v6  ;;  %v60_v20 = vmul.f32 %v49_v8, %v40_v14 }
   0xc   :  { %66 = vadd.xlane.f32.xlu0 %v65_v11  ;;  %v58_v21 = vmul.f32 %v48_v9, %v38_v15  ;;  %v68_v22 = vsel %vm64_vm0, %v56_v18, 0.0  ;;  %v61_v28 = vmul.f32 %v50_v23, %v41_v24  ;;  %v62_v29 = vmul.f32 %v50_v23, %v42_v27 }
   0xd   :  { %v77_v16 = vsel %vm64_vm0, %v59_v12, 0.0  ;;  %v71_v17 = vsel %vm64_vm0, %v57_v13, 0.0  ;;  %v80_v25 = vsel %vm64_vm0, %v60_v20, 0.0  ;;  %v100_v39 = vadd.s32 4294967288, %v98_v37 }
   0xe   :  { %78 = vadd.xlane.f32.xlu2 %v77_v16  ;;  %72 = vadd.xlane.f32.xlu1 %v71_v17  ;;  %v74_v26 = vsel %vm64_vm0, %v58_v21, 0.0  ;;  %v83_v30 = vsel %vm64_vm0, %v61_v28, 0.0  ;;  %v86_v31 = vsel %vm64_vm0, %v62_v29, 0.0  ;;  %vm115_vm4 = vcmask 1042434  }
   0xf   :  { %vm117_vm5 = vcmask 1043459  }
  0x10   :  { %v63_v56 = vld [vmem:[#allocation2] sm:$0xf] }
  0x14   :  { %69 = vadd.xlane.f32.xlu0 %v68_v22 }
  0x16   :  { %81 = vadd.xlane.f32.xlu2 %v80_v25  ;;  %75 = vadd.xlane.f32.xlu1 %v74_v26 }
  0x1c   :  { %84 = vadd.xlane.f32.xlu0 %v83_v30 }
  0x1e   :  { %87 = vadd.xlane.f32.xlu1 %v86_v31 }
  0x7f   :  { %v67_v33 = vpop.xlane.xlu0 %66 }
  0x80   :  { %v99_v47 = vperm.slane %v67_v33, %v98_v37 }
  0x81   :  { %v79_v34 = vpop.xlane.xlu2 %78  ;;  %v73_v35 = vpop.xlane.xlu1 %72 }
  0x82   :  { %v104_v43 = vperm.slane %v73_v35, %v98_v37  ;;  %v107_v45 = vperm.slane %v79_v34, %v98_v37 }
  0x87   :  { %v70_v38 = vpop.xlane.xlu0 %69 }
  0x88   :  { %v101_v44 = vperm.slane %v70_v38, %v100_v39 }
  0x89   :  { %v76_v40 = vpop.xlane.xlu1 %75  ;;  %v82_v41 = vpop.xlane.xlu2 %81 }
  0x8a   :  { %v105_v42 = vperm.slane %v76_v40, %v100_v39  ;;  %v108_v46 = vperm.slane %v82_v41, %v100_v39  ;;  %v103_v50 = vsel %vm102_vm2, %v101_v44, %v99_v47 }
  0x8c   :  { %v106_v48 = vsel %vm102_vm2, %v105_v42, %v104_v43  ;;  %v109_v52 = vsel %vm102_vm2, %v108_v46, %v107_v45 }
  0x8d   :  { %v114_v53 = vsel %vm113_vm3, %v106_v48, %v103_v50 }
  0x8e   :  { %v116_v57 = vsel %vm115_vm4, %v109_v52, %v114_v53 }
  0x8f   :  { %v85_v49 = vpop.xlane.xlu0 %84 }
  0x90   :  { %v110_v51 = vperm.slane %v85_v49, %v98_v37 }
  0x91   :  { %v88_v54 = vpop.xlane.xlu1 %87 }
  0x92   :  { %v111_v55 = vperm.slane %v88_v54, %v100_v39 }
  0x94   :  { %v112_v58 = vsel %vm102_vm2, %v111_v55, %v110_v51 }
  0x95   :  { %v118_v59 = vsel %vm117_vm5, %v112_v58, %v116_v57 }
  0x96   :  { %v120_v60 = vadd.f32 %v118_v59, %v63_v56 }
  0x98   :  { %122 = vst.msk [vmem:[#allocation2] sm:$0xf] %vm32_vm1, %v120_v60 }
  0x9f   :  { %v126_v61 = vld [vmem:[#allocation2] sm:$0xf] }
  0xa0   :  { %127 = vst.msk [vmem:[#allocation6] sm:$0xf] %vm32_vm1, %v126_v61 }
  0xa1   :  { %138 = dma.vmem_to_hbm [thread:$0]  %s134_s1, 64, %s136_s20, [#allocation5]  }
  0xa2   :  { %200 = dma.done.wait [#allocation5], 64  }
  0xa3   :  { %201 = vsyncadd [#allocation5], 4294967232 }
  0xa4   :  { %143 = vsyncpa [#allocation4], 1 }
  0xa5   :  { %144 = vsyncpa [#allocation5], 1 }

</bundles_post_ra>
